<compile_context>
chip_gen: v5e
topology: v5e:2x2
jax: 0.10.0
libtpu: 0.0.40
codegen_flags: <defaults>
</compile_context>

<pallas_src>
import functools

import jax
import jax.numpy as jnp
from jax.experimental import pallas as pl
from jax.experimental.pallas import tpu as pltpu

_LANE = 512                      # lane width of the streamed slab (multiple of 128)
_SUB = 8                         # sublane tile rows / accumulator rows
_TARGET_BLOCK_BYTES = 1 << 20    # ~1 MiB per input per block (VMEM-safe on v5e/v6e/v7x)


def _tree_fold_to_sublane(x, grp):
    """Fold (grp*8, LANE) -> (8, LANE) using tile-aligned slices + VPU adds only."""
    parts = [x[g * _SUB:(g + 1) * _SUB, :] for g in range(grp)]
    while len(parts) > 1:
        nxt = [parts[k] + parts[k + 1] for k in range(0, len(parts) - 1, 2)]
        if len(parts) % 2:
            nxt.append(parts[-1])
        parts = nxt
    return parts[0]


def _dicepp_partials_kernel(p_ref, t_ref, out_ref, acc_ref, *,
                            from_logits, gamma, block_rows):
    i = pl.program_id(1)                      # reduction axis within this shard

    @pl.when(i == 0)
    def _():
        acc_ref[...] = jnp.zeros_like(acc_ref)

    # Cast narrow inputs to f32 in-kernel (wrapper passes native dtypes).
    p = p_ref[...].astype(jnp.float32)
    t = t_ref[...].astype(jnp.float32)
    if from_logits:                           # trace-time branch
        p = jax.nn.sigmoid(p)                 # logsigmoid(x).exp() == sigmoid(x)

    one = jnp.float32(1.0)
    tp_e = p * t
    fp_b = p * (one - t)
    fn_b = (one - p) * t
    if float(gamma) == float(int(gamma)):
        g = int(gamma)
        fp_e = fp_b ** g                      # lax.integer_pow on the VPU
        fn_e = fn_b ** g
    else:
        fp_e = jnp.power(fp_b, jnp.float32(gamma))
        fn_e = jnp.power(fn_b, jnp.float32(gamma))

    grp = block_rows // _SUB
    acc_ref[0] += _tree_fold_to_sublane(tp_e, grp)
    acc_ref[1] += _tree_fold_to_sublane(fp_e, grp)
    acc_ref[2] += _tree_fold_to_sublane(fn_e, grp)
    acc_ref[3] += _tree_fold_to_sublane(t, grp)

    @pl.when(i == pl.num_programs(1) - 1)
    def _():
        out_ref[0] = acc_ref[...]             # raw (4, 8, LANE) partials per shard


def dice_plus_plus(y_pred, y_true, *, from_logits=True, smooth=0.0,
                   eps=1e-7, gamma=2):
    """Dice++ loss. y_pred / y_true: same-shaped arrays (e.g. NCHW). Returns scalar."""
    assert y_pred.shape == y_true.shape
    n = int(y_pred.size)
    assert n > 0

    # ---- tiling: lane-dense [rows, _LANE] stream, block size independent of H*W ----
    itemsize = max(y_pred.dtype.itemsize, y_true.dtype.itemsize)
    rows = -(-n // _LANE)
    rows = -(-rows // _SUB) * _SUB                                # multiple of 8
    block_rows = max(_SUB, min(_TARGET_BLOCK_BYTES // (_LANE * itemsize), rows))
    block_rows = (block_rows // _SUB) * _SUB
    num_blocks = -(-rows // block_rows)
    num_shards = 2 if num_blocks >= 2 else 1                      # v7x: one per TensorCore
    blocks_per_shard = -(-num_blocks // num_shards)
    total_blocks = num_shards * blocks_per_shard
    block_rows = -(-rows // total_blocks)                         # rebalance -> less padding
    block_rows = -(-block_rows // _SUB) * _SUB                    # keep multiple of 8
    padded_rows = total_blocks * block_rows

    # ---- pad so padded elements contribute exactly zero to all four sums ----
    p_flat = y_pred.reshape(-1)
    t_flat = y_true.reshape(-1)
    pad = padded_rows * _LANE - n
    if pad > 0:
        pad_p = -1e9 if from_logits else 0.0                      # sigmoid(-1e9) == 0
        p_flat = jnp.concatenate(
            [p_flat, jnp.full((pad,), pad_p, dtype=p_flat.dtype)])
        t_flat = jnp.concatenate(
            [t_flat, jnp.zeros((pad,), dtype=t_flat.dtype)])
    p2 = p_flat.reshape(padded_rows, _LANE)
    t2 = t_flat.reshape(padded_rows, _LANE)

    kernel = functools.partial(_dicepp_partials_kernel,
                               from_logits=bool(from_logits),
                               gamma=gamma, block_rows=block_rows)
    in_map = lambda c, i: (c * blocks_per_shard + i, 0)

    # explicit VMEM budget: 2 inputs x 2 buffers x block + accumulator + out block
    in_block_bytes = block_rows * _LANE * (y_pred.dtype.itemsize
                                           + y_true.dtype.itemsize)
    acc_bytes = 4 * _SUB * _LANE * 4
    vmem_limit = int(min(32 << 20,
                         max(16 << 20, 2 * (2 * in_block_bytes + 3 * acc_bytes))))

    partials = pl.pallas_call(
        kernel,
        out_shape=jax.ShapeDtypeStruct((num_shards, 4, _SUB, _LANE), jnp.float32),
        grid_spec=pltpu.PrefetchScalarGridSpec(
            num_scalar_prefetch=0,
            grid=(num_shards, blocks_per_shard),
            in_specs=[
                pl.BlockSpec((block_rows, _LANE), in_map),
                pl.BlockSpec((block_rows, _LANE), in_map),
            ],
            out_specs=pl.BlockSpec((1, 4, _SUB, _LANE),
                                   lambda c, i: (c, 0, 0, 0)),
            scratch_shapes=[pltpu.VMEM((4, _SUB, _LANE), jnp.float32)],
        ),
        compiler_params=pltpu.CompilerParams(
            dimension_semantics=("parallel", "arbitrary"),
            vmem_limit_bytes=vmem_limit,
        ),
    )(p2, t2)

    # One tiny final reduction + scalar Dice++ math in plain JAX.
    sums = jnp.sum(partials, axis=(0, 2, 3))          # [tp, fp, fn, sum(y_true)]
    tp, fp, fn, tsum = sums[0], sums[1], sums[2], sums[3]
    dice = (2.0 * tp + smooth) / jnp.maximum(2.0 * tp + fp + fn + smooth, eps)
    loss = (1.0 - dice) * (tsum > 0).astype(jnp.float32)
    return loss    # mean over the single flattened class channel == identity


def _ref_dicepp(p, t, from_logits=True, smooth=0.0, eps=1e-7, gamma=2):
    p = p.astype(jnp.float32)
    t = t.astype(jnp.float32)
    if from_logits:
        p = jax.nn.sigmoid(p)
    tp = jnp.sum(p * t)
    fp = jnp.sum((p * (1.0 - t)) ** gamma)
    fn = jnp.sum(((1.0 - p) * t) ** gamma)
    dice = (2.0 * tp + smooth) / jnp.maximum(2.0 * tp + fp + fn + smooth, eps)
    return (1.0 - dice) * (jnp.sum(t) > 0).astype(jnp.float32)


if __name__ == "__main__":
    key = jax.random.PRNGKey(0)
    k1, k2, k3, k4, k5, k6 = jax.random.split(key, 6)

    # --- primary check: small NCHW logits, default config (from_logits=True) ---
    B, C, H, W = 2, 4, 16, 16
    y_pred = jax.random.normal(k1, (B, C, H, W), dtype=jnp.float32)
    y_true = (jax.random.uniform(k2, (B, C, H, W)) > 0.5).astype(jnp.float32)
    loss = jax.block_until_ready(dice_plus_plus(y_pred, y_true))
    ref = _ref_dicepp(y_pred, y_true)
    assert jnp.allclose(loss, ref, rtol=1e-5, atol=1e-6), (loss, ref)

    # --- multi-block / two-shard path with native bf16 logits ---
    yp2 = jax.random.normal(k3, (2, 4, 256, 256), dtype=jnp.bfloat16)
    yt2 = (jax.random.uniform(k4, (2, 4, 256, 256)) > 0.7).astype(jnp.float32)
    loss2 = jax.block_until_ready(dice_plus_plus(yp2, yt2))
    ref2 = _ref_dicepp(yp2, yt2)
    assert jnp.allclose(loss2, ref2, rtol=1e-4, atol=1e-5), (loss2, ref2)

    # --- from_logits=False + padding path (N not a multiple of the tile) ---
    yp3 = jax.random.uniform(k5, (2, 3, 10, 10), minval=0.02, maxval=0.98)
    yt3 = (jax.random.uniform(k6, (2, 3, 10, 10)) > 0.5).astype(jnp.float32)
    loss3 = jax.block_until_ready(dice_plus_plus(yp3, yt3, from_logits=False))
    ref3 = _ref_dicepp(yp3, yt3, from_logits=False)
    assert jnp.allclose(loss3, ref3, rtol=1e-5, atol=1e-6), (loss3, ref3)

    print("KERNEL_OK")
</pallas_src>

<mosaic_0001>
module attributes {stable_mosaic.version = 11 : i64} {
  func.func @_dicepp_partials_kernel(%arg0: i32, %arg1: i32, %arg2: memref<8x512xf32, #tpu.memory_space<vmem>>, %arg3: memref<8x512xf32, #tpu.memory_space<vmem>>, %arg4: memref<1x4x8x512xf32, #tpu.memory_space<vmem>>, %arg5: memref<4x8x512xf32, #tpu.memory_space<vmem>>) attributes {dimension_semantics = [#tpu.dimension_semantics<parallel>, #tpu.dimension_semantics<arbitrary>], iteration_bounds = array<i64: 1, 1>, scalar_prefetch = 0 : i64, scratch_operands = 1 : i64, tpu.core_type = #tpu.core_type<tc>, window_params = [{transform_indices = @transform_0, window_bounds = array<i64: 8, 512>}, {transform_indices = @transform_1, window_bounds = array<i64: 8, 512>}, {transform_indices = @transform_2, window_bounds = array<i64: 1, 4, 8, 512>}]} {
    %c0_i32 = arith.constant 0 : i32
    %0 = arith.cmpi eq, %arg1, %c0_i32 : i32
    %1 = arith.extui %0 : i1 to i32
    %c0_i32_0 = arith.constant 0 : i32
    %2 = arith.cmpi ne, %1, %c0_i32_0 : i32
    scf.if %2 {
      %cst_29 = arith.constant 0.000000e+00 : f32
      %46 = vector.broadcast %cst_29 : f32 to vector<4x8x512xf32>
      %c0_30 = arith.constant 0 : index
      %c0_31 = arith.constant 0 : index
      %c0_32 = arith.constant 0 : index
      %47 = vector.load %arg5[%c0_30, %c0_31, %c0_32] : memref<4x8x512xf32, #tpu.memory_space<vmem>>, vector<4x8x512xf32>
      tpu.vector_store %arg5[%c0_30, %c0_31, %c0_32], %46 {strides = array<i32>} : memref<4x8x512xf32, #tpu.memory_space<vmem>>, vector<4x8x512xf32>,
    } else {
    }
    %c0 = arith.constant 0 : index
    %c0_1 = arith.constant 0 : index
    %3 = vector.load %arg2[%c0, %c0_1] : memref<8x512xf32, #tpu.memory_space<vmem>>, vector<8x512xf32>
    %c0_2 = arith.constant 0 : index
    %c0_3 = arith.constant 0 : index
    %4 = vector.load %arg3[%c0_2, %c0_3] : memref<8x512xf32, #tpu.memory_space<vmem>>, vector<8x512xf32>
    %5 = arith.negf %3 : vector<8x512xf32>
    %6 = math.exp %5 : vector<8x512xf32>
    %cst = arith.constant 1.000000e+00 : f32
    %7 = vector.broadcast %cst : f32 to vector<8x512xf32>
    %8 = arith.addf %7, %6 : vector<8x512xf32>
    %9 = arith.divf %7, %8 : vector<8x512xf32>
    %10 = arith.mulf %9, %4 : vector<8x512xf32>
    %cst_4 = arith.constant 1.000000e+00 : f32
    %11 = vector.broadcast %cst_4 : f32 to vector<8x512xf32>
    %12 = arith.subf %11, %4 : vector<8x512xf32>
    %13 = arith.mulf %9, %12 : vector<8x512xf32>
    %cst_5 = arith.constant 1.000000e+00 : f32
    %14 = vector.broadcast %cst_5 : f32 to vector<8x512xf32>
    %15 = arith.subf %14, %9 : vector<8x512xf32>
    %16 = arith.mulf %15, %4 : vector<8x512xf32>
    %17 = arith.mulf %13, %13 : vector<8x512xf32>
    %18 = arith.mulf %16, %16 : vector<8x512xf32>
    %c0_6 = arith.constant 0 : index
    %c0_7 = arith.constant 0 : index
    %c0_8 = arith.constant 0 : index
    %19 = vector.load %arg5[%c0_6, %c0_7, %c0_8] : memref<4x8x512xf32, #tpu.memory_space<vmem>>, vector<1x8x512xf32>
    %20 = vector.shape_cast %19 : vector<1x8x512xf32> to vector<8x512xf32>
    %21 = arith.addf %20, %10 : vector<8x512xf32>
    %c0_9 = arith.constant 0 : index
    %c0_10 = arith.constant 0 : index
    %c0_11 = arith.constant 0 : index
    %22 = vector.load %arg5[%c0_9, %c0_10, %c0_11] : memref<4x8x512xf32, #tpu.memory_space<vmem>>, vector<1x8x512xf32>
    %23 = vector.shape_cast %22 : vector<1x8x512xf32> to vector<8x512xf32>
    %24 = vector.shape_cast %21 : vector<8x512xf32> to vector<1x8x512xf32>
    tpu.vector_store %arg5[%c0_9, %c0_10, %c0_11], %24 {strides = array<i32>} : memref<4x8x512xf32, #tpu.memory_space<vmem>>, vector<1x8x512xf32>,
    %c1 = arith.constant 1 : index
    %c0_12 = arith.constant 0 : index
    %c0_13 = arith.constant 0 : index
    %25 = vector.load %arg5[%c1, %c0_12, %c0_13] : memref<4x8x512xf32, #tpu.memory_space<vmem>>, vector<1x8x512xf32>
    %26 = vector.shape_cast %25 : vector<1x8x512xf32> to vector<8x512xf32>
    %27 = arith.addf %26, %17 : vector<8x512xf32>
    %c1_14 = arith.constant 1 : index
    %c0_15 = arith.constant 0 : index
    %c0_16 = arith.constant 0 : index
    %28 = vector.load %arg5[%c1_14, %c0_15, %c0_16] : memref<4x8x512xf32, #tpu.memory_space<vmem>>, vector<1x8x512xf32>
    %29 = vector.shape_cast %28 : vector<1x8x512xf32> to vector<8x512xf32>
    %30 = vector.shape_cast %27 : vector<8x512xf32> to vector<1x8x512xf32>
    tpu.vector_store %arg5[%c1_14, %c0_15, %c0_16], %30 {strides = array<i32>} : memref<4x8x512xf32, #tpu.memory_space<vmem>>, vector<1x8x512xf32>,
    %c2 = arith.constant 2 : index
    %c0_17 = arith.constant 0 : index
    %c0_18 = arith.constant 0 : index
    %31 = vector.load %arg5[%c2, %c0_17, %c0_18] : memref<4x8x512xf32, #tpu.memory_space<vmem>>, vector<1x8x512xf32>
    %32 = vector.shape_cast %31 : vector<1x8x512xf32> to vector<8x512xf32>
    %33 = arith.addf %32, %18 : vector<8x512xf32>
    %c2_19 = arith.constant 2 : index
    %c0_20 = arith.constant 0 : index
    %c0_21 = arith.constant 0 : index
    %34 = vector.load %arg5[%c2_19, %c0_20, %c0_21] : memref<4x8x512xf32, #tpu.memory_space<vmem>>, vector<1x8x512xf32>
    %35 = vector.shape_cast %34 : vector<1x8x512xf32> to vector<8x512xf32>
    %36 = vector.shape_cast %33 : vector<8x512xf32> to vector<1x8x512xf32>
    tpu.vector_store %arg5[%c2_19, %c0_20, %c0_21], %36 {strides = array<i32>} : memref<4x8x512xf32, #tpu.memory_space<vmem>>, vector<1x8x512xf32>,
    %c3 = arith.constant 3 : index
    %c0_22 = arith.constant 0 : index
    %c0_23 = arith.constant 0 : index
    %37 = vector.load %arg5[%c3, %c0_22, %c0_23] : memref<4x8x512xf32, #tpu.memory_space<vmem>>, vector<1x8x512xf32>
    %38 = vector.shape_cast %37 : vector<1x8x512xf32> to vector<8x512xf32>
    %39 = arith.addf %38, %4 : vector<8x512xf32>
    %c3_24 = arith.constant 3 : index
    %c0_25 = arith.constant 0 : index
    %c0_26 = arith.constant 0 : index
    %40 = vector.load %arg5[%c3_24, %c0_25, %c0_26] : memref<4x8x512xf32, #tpu.memory_space<vmem>>, vector<1x8x512xf32>
    %41 = vector.shape_cast %40 : vector<1x8x512xf32> to vector<8x512xf32>
    %42 = vector.shape_cast %39 : vector<8x512xf32> to vector<1x8x512xf32>
    tpu.vector_store %arg5[%c3_24, %c0_25, %c0_26], %42 {strides = array<i32>} : memref<4x8x512xf32, #tpu.memory_space<vmem>>, vector<1x8x512xf32>,
    %c0_i32_27 = arith.constant 0 : i32
    %43 = arith.cmpi eq, %arg1, %c0_i32_27 : i32
    %44 = arith.extui %43 : i1 to i32
    %c0_i32_28 = arith.constant 0 : i32
    %45 = arith.cmpi ne, %44, %c0_i32_28 : i32
    scf.if %45 {
      %c0_29 = arith.constant 0 : index
      %c0_30 = arith.constant 0 : index
      %c0_31 = arith.constant 0 : index
      %46 = vector.load %arg5[%c0_29, %c0_30, %c0_31] : memref<4x8x512xf32, #tpu.memory_space<vmem>>, vector<4x8x512xf32>
      %c0_32 = arith.constant 0 : index
      %c0_33 = arith.constant 0 : index
      %c0_34 = arith.constant 0 : index
      %c0_35 = arith.constant 0 : index
      %47 = vector.load %arg4[%c0_32, %c0_33, %c0_34, %c0_35] : memref<1x4x8x512xf32, #tpu.memory_space<vmem>>, vector<1x4x8x512xf32>
      %48 = vector.shape_cast %47 : vector<1x4x8x512xf32> to vector<4x8x512xf32>
      %49 = vector.shape_cast %46 : vector<4x8x512xf32> to vector<1x4x8x512xf32>
      tpu.vector_store %arg4[%c0_32, %c0_33, %c0_34, %c0_35], %49 {strides = array<i32>} : memref<1x4x8x512xf32, #tpu.memory_space<vmem>>, vector<1x4x8x512xf32>,
    } else {
    }
    return
  }
  func.func @transform_0(%arg0: i32, %arg1: i32) -> (i32, i32) {
    %c1_i32 = arith.constant 1 : i32
    %0 = arith.muli %arg0, %c1_i32 : i32
    %1 = arith.addi %0, %arg1 : i32
    %c0_i32 = arith.constant 0 : i32
    %c0_i32_0 = arith.constant 0 : i32
    return %1, %c0_i32 : i32, i32
  }
  func.func @transform_1(%arg0: i32, %arg1: i32) -> (i32, i32) {
    %c1_i32 = arith.constant 1 : i32
    %0 = arith.muli %arg0, %c1_i32 : i32
    %1 = arith.addi %0, %arg1 : i32
    %c0_i32 = arith.constant 0 : i32
    %c0_i32_0 = arith.constant 0 : i32
    return %1, %c0_i32 : i32, i32
  }
  func.func @transform_2(%arg0: i32, %arg1: i32) -> (i32, i32, i32, i32) {
    %c0_i32 = arith.constant 0 : i32
    %c0_i32_0 = arith.constant 0 : i32
    %c0_i32_1 = arith.constant 0 : i32
    %c0_i32_2 = arith.constant 0 : i32
    return %arg0, %c0_i32, %c0_i32_0, %c0_i32_1 : i32, i32, i32, i32
  }
}

</mosaic_0001>

<bundles_post_ra>
// kernel: tpu_custom_call.1
= control target key start
LH: loop header
LB: loop body
LE: loop exit
PB: predicated region body
PF: predicated region fallthrough
CT: control target
= control target key end

     0   :  { %7 = vsyncpa [#allocation4], 0  ;;  %s500_s0 = inlined_call_operand.hbm [shape: f32[8,512], index: 0, kind: input, shape index: {}]   ;;  %s501_s1 = inlined_call_operand.hbm [shape: f32[8,512], index: 1, kind: input, shape index: {}]   ;;  %s502_s2 = inlined_call_operand.hbm [shape: f32[1,4,8,512], index: 2, kind: output, shape index: {}]  }
   0x1   :  { %8 = vsyncpa [#allocation7], 0 }
   0x2   :  { %9 = vsyncpa [#allocation5], 0  ;;  %s19_s11 = sshll.u32 %s500_s0, 4  ;;  %s391_s12 = smov [#allocation3]   ;;  %s20_s11 = int_to_ptr.hbm [resolvable:$true] %s19_s11 }
   0x3   :  { %s21_s13 = sshll.u32 %s391_s12, 4  ;;  %s34_s16 = sshll.u32 %s501_s1, 4  ;;  %s22_s13 = int_to_ptr.vmem [resolvable:$true] %s21_s13  ;;  %s35_s16 = int_to_ptr.hbm [resolvable:$true] %s34_s16 }
   0x4   :  { %24 = dma.hbm_to_vmem [thread:$0]  %s20_s11, 512, %s22_s13, [#allocation4]  }
   0x5   :  { %s392_s17 = smov [#allocation6]  }
   0x6   :  { %s36_s18 = sshll.u32 %s392_s17, 4  ;;  %s37_s18 = int_to_ptr.vmem [resolvable:$true] %s36_s18 }
   0x7   :  { %39 = dma.hbm_to_vmem [thread:$0]  %s35_s16, 512, %s37_s18, [#allocation7]  }
   0x8   :  { %385 = dma.done.wait [#allocation4], 512  }
   0x9   :  { %386 = vsyncadd [#allocation4], 4294966784 }
   0xa   :  { %387 = dma.done.wait [#allocation7], 512  }
   0xb   :  { %388 = vsyncadd [#allocation7], 4294966784  ;;  %v70_v0 = vld [vmem:[#allocation3] sm:$0xff]  ;;  %v71_v2 = vld [vmem:[#allocation3 + $0x8] sm:$0xff]  ;;  %s393_s0 = smov [#allocation8]   ;;  %s274_s21 = sshll.u32 %s502_s2, 4  ;;  %s275_s21 = int_to_ptr.hbm [resolvable:$true] %s274_s21 }
   0xc   :  { %v417_v1 = vld [vmem:[#allocation6] sm:$0xff]  ;;  %v288_v3 = vmul.f32 -1.442695, %v70_v0  ;;  %v420_v4 = vld [vmem:[#allocation6 + $0x8] sm:$0xff]  ;;  %v289_v5 = vmul.f32 -1.442695, %v71_v2 }
   0xd   :  { %264 = vst [vmem:[#allocation8 + $0x60] sm:$0xff] %v417_v1  ;;  %v72_v6 = vld [vmem:[#allocation3 + $0x10] sm:$0xff]  ;;  %v73_v8 = vld [vmem:[#allocation3 + $0x18] sm:$0xff]  ;;  %v158_v25 = vsub.f32 1.0, %v417_v1  ;;  %v159_v28 = vsub.f32 1.0, %v420_v4  ;;  %s272_s1 = sshll.u32 %s393_s0, 4  ;;  %s273_s1 = int_to_ptr.vmem [resolvable:$true] %s272_s1 }
   0xe   :  { %265 = vst [vmem:[#allocation8 + $0x68] sm:$0xff] %v420_v4  ;;  %v423_v7 = vld [vmem:[#allocation6 + $0x10] sm:$0xff]  ;;  %297 = vpow2.f32 %v288_v3  ;;  %v290_v9 = vmul.f32 -1.442695, %v72_v6  ;;  %v426_v10 = vld [vmem:[#allocation6 + $0x18] sm:$0xff]  ;;  %s394_s22 = smov 512  }
   0xf   :  { %266 = vst [vmem:[#allocation8 + $0x70] sm:$0xff] %v423_v7  ;;  %v291_v11 = vmul.f32 -1.442695, %v73_v8  ;;  %299 = vpow2.f32 %v289_v5  ;;  %v160_v29 = vsub.f32 1.0, %v423_v7  ;;  %v161_v30 = vsub.f32 1.0, %v426_v10  ;;  %s395_s23 = smov 32  }
  0x10   :  { %267 = vst [vmem:[#allocation8 + $0x78] sm:$0xff] %v426_v10  ;;  %301 = vpow2.f32 %v290_v9 }
  0x11   :  { %303 = vpow2.f32 %v291_v11 }
  0x14   :  { %v298_v12 = vpop.eup %297 }
  0x15   :  { %v300_v13 = vpop.eup %299  ;;  %v90_v14 = vadd.f32 1.0, %v298_v12 }
  0x16   :  { %v302_v15 = vpop.eup %301  ;;  %v91_v16 = vadd.f32 1.0, %v300_v13 }
  0x17   :  { %v304_v17 = vpop.eup %303  ;;  %305 = vrcp.f32 %v90_v14  ;;  %v92_v18 = vadd.f32 1.0, %v302_v15  ;;  %v103_v20 = vand.u32 2147483647, %v90_v14  ;;  %v105_v21 = vand.u32 2147483648, %v90_v14 }
  0x18   :  { %307 = vrcp.f32 %v91_v16  ;;  %v93_v19 = vadd.f32 1.0, %v304_v17  ;;  %v118_v22 = vand.u32 2147483647, %v91_v16  ;;  %v120_v24 = vand.u32 2147483648, %v91_v16 }
  0x19   :  { %309 = vrcp.f32 %v92_v18  ;;  %vm99_vm0 = vweird.f32 %v90_v14  ;;  %vm433_vm1 = vcmp.eq.f32.partialorder %v103_v20, 8.507059e+37  ;;  %vm114_vm2 = vweird.f32 %v91_v16 }
  0x1a   :  { %311 = vrcp.f32 %v93_v19  ;;  %v106_v34 = vor.u32 1.1754944e-38, %v105_v21  ;;  %vm437_vm4 = vcmp.eq.f32.partialorder %v118_v22, 8.507059e+37  ;;  %v121_v38 = vor.u32 1.1754944e-38, %v120_v24 }
  0x1b   :  { %v133_v39 = vand.u32 2147483647, %v92_v18  ;;  %v135_v43 = vand.u32 2147483648, %v92_v18  ;;  %v148_v44 = vand.u32 2147483647, %v93_v19  ;;  %vm129_vm7 = vweird.f32 %v92_v18 }
  0x1c   :  { %v150_v48 = vand.u32 2147483648, %v93_v19  ;;  %vm144_vm10 = vweird.f32 %v93_v19 }
  0x1d   :  { %v306_v23 = vpop.eup %305  ;;  %vm451_vm11 = vcmp.eq.f32.partialorder %v133_v39, 8.507059e+37  ;;  %v136_v57 = vor.u32 1.1754944e-38, %v135_v43  ;;  %vm457_vm13 = vcmp.eq.f32.partialorder %v148_v44, 8.507059e+37 }
  0x1e   :  { %v308_v26 = vpop.eup %307  ;;  %v95_v27 = vmul.f32 %v306_v23, %v90_v14  ;;  %vm100_vm3 = vweird.f32 %v306_v23  ;;  %v151_v63 = vor.u32 1.1754944e-38, %v150_v48 }
  0x1f   :  { %v110_v32 = vmul.f32 %v308_v26, %v91_v16  ;;  %v310_v36 = vpop.eup %309  ;;  %vm115_vm5 = vweird.f32 %v308_v26  ;;  %vm442_vm6 = vmor %vm99_vm0, %vm100_vm3 }
  0x20   :  { %v96_v33 = vsub.f32 1.0, %v95_v27  ;;  %v312_v40 = vpop.eup %311  ;;  %v125_v42 = vmul.f32 %v310_v36, %v92_v18  ;;  %vm447_vm8 = vmor %vm114_vm2, %vm115_vm5  ;;  %vm130_vm9 = vweird.f32 %v310_v36 }
  0x21   :  { %v111_v37 = vsub.f32 1.0, %v110_v32  ;;  %v140_v47 = vmul.f32 %v312_v40, %v93_v19  ;;  %vm145_vm12 = vweird.f32 %v312_v40  ;;  %vm466_vm14 = vmor %vm129_vm7, %vm130_vm9 }
  0x22   :  { %v97_v41 = vmul.f32 %v306_v23, %v96_v33  ;;  %v126_v51 = vsub.f32 1.0, %v125_v42  ;;  %vm474_vm15 = vmor %vm144_vm10, %vm145_vm12 }
  0x23   :  { %v112_v46 = vmul.f32 %v308_v26, %v111_v37  ;;  %v141_v54 = vsub.f32 1.0, %v140_v47 }
  0x24   :  { %v98_v49 = vadd.f32 %v306_v23, %v97_v41  ;;  %v127_v56 = vmul.f32 %v310_v36, %v126_v51 }
  0x25   :  { %v113_v52 = vadd.f32 %v308_v26, %v112_v46  ;;  %v142_v62 = vmul.f32 %v312_v40, %v141_v54 }
  0x26   :  { %v102_v55 = vsel %vm442_vm6, %v306_v23, %v98_v49  ;;  %v128_v3 = vadd.f32 %v310_v36, %v127_v56 }
  0x27   :  { %v107_v59 = vsel %vm433_vm1, %v106_v34, %v102_v55  ;;  %v117_v60 = vsel %vm447_vm8, %v308_v26, %v113_v52  ;;  %v143_v9 = vadd.f32 %v312_v40, %v142_v62 }
  0x28   :  { %v154_v0 = vmul.f32 %v107_v59, %v417_v1  ;;  %v122_v2 = vsel %vm437_vm4, %v121_v38, %v117_v60  ;;  %v162_v6 = vmul.f32 %v158_v25, %v107_v59  ;;  %v166_v12 = vsub.f32 1.0, %v107_v59 }
  0x29   :  { %v155_v8 = vmul.f32 %v122_v2, %v420_v4  ;;  %v163_v11 = vmul.f32 %v159_v28, %v122_v2  ;;  %v132_v13 = vsel %vm466_vm14, %v310_v36, %v128_v3  ;;  %v167_v15 = vsub.f32 1.0, %v122_v2 }
  0x2a   :  { %252 = vst [vmem:[#allocation8] sm:$0xff] %v154_v0  ;;  %v174_v14 = vmul.f32 %v162_v6, %v162_v6  ;;  %v137_v16 = vsel %vm451_vm11, %v136_v57, %v132_v13  ;;  %v147_v17 = vsel %vm474_vm15, %v312_v40, %v143_v9  ;;  %v170_v19 = vmul.f32 %v166_v12, %v417_v1 }
  0x2b   :  { %253 = vst [vmem:[#allocation8 + $0x8] sm:$0xff] %v155_v8  ;;  %v175_v18 = vmul.f32 %v163_v11, %v163_v11  ;;  %v156_v20 = vmul.f32 %v137_v16, %v423_v7  ;;  %v152_v21 = vsel %vm457_vm13, %v151_v63, %v147_v17  ;;  %v164_v22 = vmul.f32 %v160_v29, %v137_v16 }
  0x2c   :  { %256 = vst [vmem:[#allocation8 + $0x20] sm:$0xff] %v174_v14  ;;  %v171_v23 = vmul.f32 %v167_v15, %v420_v4  ;;  %v157_v24 = vmul.f32 %v152_v21, %v426_v10  ;;  %v165_v25 = vmul.f32 %v161_v30, %v152_v21  ;;  %v168_v26 = vsub.f32 1.0, %v137_v16 }
  0x2d   :  { %257 = vst [vmem:[#allocation8 + $0x28] sm:$0xff] %v175_v18  ;;  %v176_v1 = vmul.f32 %v164_v22, %v164_v22  ;;  %v178_v27 = vmul.f32 %v170_v19, %v170_v19  ;;  %v169_v28 = vsub.f32 1.0, %v152_v21 }
  0x2e   :  { %254 = vst [vmem:[#allocation8 + $0x10] sm:$0xff] %v156_v20  ;;  %v177_v31 = vmul.f32 %v165_v25, %v165_v25  ;;  %v179_v32 = vmul.f32 %v171_v23, %v171_v23  ;;  %v172_v33 = vmul.f32 %v168_v26, %v423_v7 }
  0x2f   :  { %255 = vst [vmem:[#allocation8 + $0x18] sm:$0xff] %v157_v24  ;;  %v173_v4 = vmul.f32 %v169_v28, %v426_v10 }
  0x30   :  { %258 = vst [vmem:[#allocation8 + $0x30] sm:$0xff] %v176_v1  ;;  %v180_v29 = vmul.f32 %v172_v33, %v172_v33 }
  0x31   :  { %259 = vst [vmem:[#allocation8 + $0x38] sm:$0xff] %v177_v31  ;;  %v181_v30 = vmul.f32 %v173_v4, %v173_v4 }
  0x32   :  { %260 = vst [vmem:[#allocation8 + $0x40] sm:$0xff] %v178_v27 }
  0x33   :  { %261 = vst [vmem:[#allocation8 + $0x48] sm:$0xff] %v179_v32 }
  0x34   :  { %262 = vst [vmem:[#allocation8 + $0x50] sm:$0xff] %v180_v29 }
  0x35   :  { %263 = vst [vmem:[#allocation8 + $0x58] sm:$0xff] %v181_v30 }
  0x36   :  { %280 = dma.vmem_to_hbm [thread:$0]  %s273_s1, 2048, %s275_s21, [#allocation5], %s394_s22, %s394_s22, %s395_s23  }
  0x37   :  { %389 = dma.done.wait [#allocation5], 2048  }
  0x38   :  { %390 = vsyncadd [#allocation5], 4294965248 }
  0x39   :  { %285 = vsyncpa [#allocation4], 1 }
  0x3a   :  { %286 = vsyncpa [#allocation7], 1 }
  0x3b   :  { %287 = vsyncpa [#allocation5], 1 }

</bundles_post_ra>
